<compile_context>
chip_gen: v6e
topology: v6e:2x2x1
jax: 0.10.0
libtpu: 0.0.40
codegen_flags: <defaults>
</compile_context>

<pallas_src>
import jax
import jax.numpy as jnp
from jax.experimental import pallas as pl
from jax.experimental.pallas import tpu as pltpu


def _round_up(x, m):
    return ((x + m - 1) // m) * m


def _vmem_cap_bytes():
    """3/4 of physical VMEM (leaves headroom for Mosaic internal scratch)."""
    try:
        cap = pltpu.get_tpu_info().vmem_capacity_bytes
    except Exception:
        cap = 64 << 20          # conservative default (v7x per-TC VMEM)
    return max(int(cap) * 3 // 4, 32 << 20)


def _fused_body_heads_kernel(x_ref, wb_ref, bb_ref, wh_ref, bh_ref, o_ref):
    """relu(x @ Wb + bb) @ Wheads + bheads on one (tb, D) batch tile.

    x / Wb / Wheads are bf16 (MXU rate, half the bytes); both matmuls
    accumulate in f32.  Wheads packs every task head along the output (lane)
    axis, zero-padded to a multiple of 128 lanes, so the store is lane-dense.
    """
    x = x_ref[...]
    h = jnp.dot(x, wb_ref[...], preferred_element_type=jnp.float32)
    h = jnp.maximum(h + bb_ref[...], 0.0)          # body bias + ReLU (f32, VPU)
    h = h.astype(wh_ref.dtype)                     # bf16 for the second MXU pass
    y = jnp.dot(h, wh_ref[...], preferred_element_type=jnp.float32) + bh_ref[...]
    o_ref[...] = y.astype(o_ref.dtype)


def fused_body_heads(x, w_body, b_body, w_heads, b_heads, *, tb=512,
                     compute_dtype=jnp.bfloat16):
    """Single pallas_call: body + ALL packed heads over a row-stacked [R, D] batch."""
    R, D = x.shape
    H = w_body.shape[1]
    P = w_heads.shape[1]          # multiple of 128 (lane-dense output)

    itemsize = jnp.dtype(compute_dtype).itemsize
    gran = 16 if itemsize == 2 else 8            # sublane granule (packed rows)

    x = x.astype(compute_dtype)
    w_body = w_body.astype(compute_dtype)
    w_heads = w_heads.astype(compute_dtype)
    b_body = b_body.astype(jnp.float32)
    b_heads = b_heads.astype(jnp.float32)

    # Pad rows only to the sublane granule; the grid uses cdiv so an awkward R
    # wastes at most (gran-1) rows, not up to tb-1.
    Rp = _round_up(R, gran)
    if Rp != R:
        x = jnp.pad(x, ((0, Rp - R), (0, 0)))

    # Batch tile: multiple of the granule, <= Rp, and (when possible) capped so
    # the grid has >= 2 tiles -> both v7x TensorCores get work.
    tb = max(gran, _round_up(min(tb, Rp), gran))
    if Rp >= 2 * gran:
        tb = min(tb, _round_up(pl.cdiv(Rp, 2), gran))
    grid = (pl.cdiv(Rp, tb),)

    def _call(param_buffers):
        # VMEM budget: double-buffered x/out tiles, hidden intermediates,
        # resident params (single- or double-buffered) + scratch headroom.
        vmem_bytes = (2 * itemsize * tb * D                     # x tiles
                      + 2 * 4 * tb * P                          # out tiles (f32)
                      + 4 * tb * H + itemsize * tb * H          # h (f32 + bf16 copy)
                      + 4 * tb * P                              # y intermediate
                      + param_buffers * (itemsize * (D * H + H * P) + 4 * (H + P))
                      + (4 << 20))                              # Mosaic scratch headroom
        vmem_bytes = int(min(max(vmem_bytes, 8 << 20), _vmem_cap_bytes()))

        def wspec(shape):
            if param_buffers == 1:
                return pl.BlockSpec(shape, lambda i: (0, 0),
                                    pipeline_mode=pl.Buffered(buffer_count=1))
            return pl.BlockSpec(shape, lambda i: (0, 0))

        return pl.pallas_call(
            _fused_body_heads_kernel,
            out_shape=jax.ShapeDtypeStruct((Rp, P), jnp.float32),
            grid_spec=pl.GridSpec(
                grid=grid,
                in_specs=[
                    pl.BlockSpec((tb, D), lambda i: (i, 0)),   # batch tile (pipelined)
                    wspec((D, H)),                             # body weight (resident)
                    wspec((1, H)),                             # body bias   (resident)
                    wspec((H, P)),                             # packed head weights
                    wspec((1, P)),                             # packed head biases
                ],
                out_specs=pl.BlockSpec((tb, P), lambda i: (i, 0)),
            ),
            compiler_params=pltpu.CompilerParams(
                dimension_semantics=("parallel",),   # megacore sharding of batch tiles
                vmem_limit_bytes=vmem_bytes,
            ),
        )(x, w_body, b_body, w_heads, b_heads)

    try:
        out = _call(1)     # single-buffer the resident params (saves VMEM)
    except Exception:
        out = _call(2)     # fallback if Buffered(1) is rejected by this jax/jaxlib
    return out[:R]


class MultiTaskModel:
    """JAX/Pallas port of the PyTorch MultiTaskModel forward pass."""

    def __init__(self, body_params, head_params, *, batch_tile=512,
                 compute_dtype=jnp.bfloat16):
        # body_params: (w_body [D,H], b_body [1,H]); head_params: {name: (w [H,O], b [1,O])}
        self.head_params = dict(head_params)
        self.batch_tile = batch_tile
        self.compute_dtype = compute_dtype

        wb, bb = body_params
        self.w_body = jnp.asarray(wb).astype(compute_dtype)     # cast once, not per call
        self.b_body = jnp.asarray(bb).reshape(1, -1).astype(jnp.float32)

        # Pack every head along the output (lane) axis once; pad to >=128 lanes.
        offsets, col = {}, 0
        ws, bs = [], []
        for name, (w, b) in self.head_params.items():
            offsets[name] = (col, w.shape[1])
            col += w.shape[1]
            ws.append(jnp.asarray(w))
            bs.append(jnp.asarray(b).reshape(1, -1))
        packed_w = jnp.concatenate(ws, axis=1)
        packed_b = jnp.concatenate(bs, axis=1)
        P = max(_round_up(col, 128), 128)
        self.w_heads = jnp.pad(packed_w, ((0, 0), (0, P - col))).astype(compute_dtype)
        self.b_heads = jnp.pad(packed_b, ((0, 0), (0, P - col))).astype(jnp.float32)
        self._head_offsets = offsets

    def forward(self, name_to_batch, meta):
        # Stack every task batch (and pairwise pos/neg halves) along rows so the
        # whole multi-task forward is ONE kernel launch; slice rows/columns after.
        # TODO(synk): for large batches, pre-stack rows at the data-loader level (or
        # pass per-task row offsets via PrefetchScalarGridSpec) to avoid this
        # wrapper-side concat's extra HBM pass over the inputs.
        segments = []      # (name, kind, row_start, n_pos_rows, n_neg_rows)
        chunks = []
        row = 0
        for name in name_to_batch:
            batch = name_to_batch[name]
            if meta[name] and meta[name].get('pairwise'):
                pos, neg = batch['pos'], batch['neg']
                segments.append((name, 'pairwise', row, pos.shape[0], neg.shape[0]))
                chunks.extend([pos, neg])
                row += pos.shape[0] + neg.shape[0]
            else:
                segments.append((name, 'plain', row, batch.shape[0], 0))
                chunks.append(batch)
                row += batch.shape[0]
        if not chunks:
            return {}

        x_all = chunks[0] if len(chunks) == 1 else jnp.concatenate(chunks, axis=0)
        out = fused_body_heads(x_all, self.w_body, self.b_body,
                               self.w_heads, self.b_heads,
                               tb=self.batch_tile, compute_dtype=self.compute_dtype)

        preds = {}
        for name, kind, start, n0, n1 in segments:
            off, width = self._head_offsets[name]
            if kind == 'pairwise':
                p_pos = out[start:start + n0, off:off + width]
                p_neg = out[start + n0:start + n0 + n1, off:off + width]
                preds[name] = jnp.concatenate([p_pos, p_neg], axis=-1)   # torch.cat(dim=-1)
            else:
                preds[name] = out[start:start + n0, off:off + width]
        return preds

    @property
    def output_names(self):
        return list(self.head_params.keys())


def _reference_forward(x, wb, bb, wh, bh, dtype=jnp.bfloat16):
    """Pure-JAX reference with the same bf16-in / f32-accumulate precision."""
    h = jnp.dot(x.astype(dtype), wb.astype(dtype),
                preferred_element_type=jnp.float32) + bb
    h = jnp.maximum(h, 0.0)
    return jnp.dot(h.astype(dtype), wh.astype(dtype),
                   preferred_element_type=jnp.float32) + bh


if __name__ == "__main__":
    key = jax.random.PRNGKey(0)
    B, D, H, O = 8, 32, 128, 8   # batch, in_dim, hidden, per-head out_dim

    ks = jax.random.split(key, 8)
    # Deterministic synthetic parameters.
    w_body = jax.random.normal(ks[0], (D, H), jnp.float32) * 0.1
    b_body = jax.random.normal(ks[1], (1, H), jnp.float32) * 0.1
    heads = {
        "taskA": (jax.random.normal(ks[2], (H, O), jnp.float32) * 0.1,
                  jax.random.normal(ks[3], (1, O), jnp.float32) * 0.1),
        "taskB": (jax.random.normal(ks[4], (H, O), jnp.float32) * 0.1,
                  jax.random.normal(ks[5], (1, O), jnp.float32) * 0.1),
    }
    model = MultiTaskModel((w_body, b_body), heads)

    # Batches: taskA is a plain dataset batch; taskB is a pairwise batch.
    x_a = jax.random.normal(ks[6], (B, D), jnp.float32)
    kp, kn = jax.random.split(ks[7])
    x_pos = jax.random.normal(kp, (B, D), jnp.float32)
    x_neg = jax.random.normal(kn, (B, D), jnp.float32)

    name_to_batch = {
        "taskA": x_a,
        "taskB": {"pos": x_pos, "neg": x_neg},
    }
    meta = {
        "taskA": {},                    # falsy -> dataset forward
        "taskB": {"pairwise": True},    # pairwise forward
    }

    preds = model.forward(name_to_batch, meta)
    preds = jax.block_until_ready(preds)

    # Sanity check against a precision-matched pure-JAX reference.
    wa, ba = heads["taskA"]
    wb_h, bb_h = heads["taskB"]
    ref_a = _reference_forward(x_a, w_body, b_body, wa, ba)
    ref_b = jnp.concatenate(
        [_reference_forward(x_pos, w_body, b_body, wb_h, bb_h),
         _reference_forward(x_neg, w_body, b_body, wb_h, bb_h)], axis=-1)
    assert preds["taskA"].shape == (B, O)
    assert preds["taskB"].shape == (B, 2 * O)
    assert jnp.allclose(preds["taskA"], ref_a, atol=2e-3, rtol=2e-3)
    assert jnp.allclose(preds["taskB"], ref_b, atol=2e-3, rtol=2e-3)

    print("KERNEL_OK")
</pallas_src>

<mosaic_0001>
module attributes {stable_mosaic.version = 11 : i64} {
  func.func @_fused_body_heads_kernel(%arg0: i32, %arg1: memref<16x32xbf16, #tpu.memory_space<vmem>>, %arg2: memref<32x128xbf16, #tpu.memory_space<vmem>>, %arg3: memref<1x128xf32, #tpu.memory_space<vmem>>, %arg4: memref<128x128xbf16, #tpu.memory_space<vmem>>, %arg5: memref<1x128xf32, #tpu.memory_space<vmem>>, %arg6: memref<16x128xf32, #tpu.memory_space<vmem>>) attributes {dimension_semantics = [#tpu.dimension_semantics<parallel>], iteration_bounds = array<i64: 2>, scalar_prefetch = 0 : i64, scratch_operands = 0 : i64, tpu.core_type = #tpu.core_type<tc>, window_params = [{transform_indices = @transform_0, window_bounds = array<i64: 16, 32>}, {pipeline_mode = #tpu.pipeline_mode<synchronous>, transform_indices = @transform_1, window_bounds = array<i64: 32, 128>}, {pipeline_mode = #tpu.pipeline_mode<synchronous>, transform_indices = @transform_2, window_bounds = array<i64: 1, 128>}, {pipeline_mode = #tpu.pipeline_mode<synchronous>, transform_indices = @transform_3, window_bounds = array<i64: 128, 128>}, {pipeline_mode = #tpu.pipeline_mode<synchronous>, transform_indices = @transform_4, window_bounds = array<i64: 1, 128>}, {transform_indices = @transform_5, window_bounds = array<i64: 16, 128>}]} {
    %c0 = arith.constant 0 : index
    %c0_0 = arith.constant 0 : index
    %0 = vector.load %arg1[%c0, %c0_0] : memref<16x32xbf16, #tpu.memory_space<vmem>>, vector<16x32xbf16>
    %c0_1 = arith.constant 0 : index
    %c0_2 = arith.constant 0 : index
    %1 = vector.load %arg2[%c0_1, %c0_2] : memref<32x128xbf16, #tpu.memory_space<vmem>>, vector<32x128xbf16>
    %cst = arith.constant dense<0.000000e+00> : vector<16x128xf32>
    %2 = tpu.matmul %0, %1, %cst {dimension_numbers = #tpu.dot_dimension_numbers<[1], [0], [0], [1], [0, 0, 1, 1], [], []>} : vector<16x32xbf16>, vector<32x128xbf16>, vector<16x128xf32> -> vector<16x128xf32>
    %c0_3 = arith.constant 0 : index
    %c0_4 = arith.constant 0 : index
    %3 = vector.load %arg3[%c0_3, %c0_4] : memref<1x128xf32, #tpu.memory_space<vmem>>, vector<1x128xf32>
    %4 = vector.broadcast %3 : vector<1x128xf32> to vector<16x128xf32>
    %5 = arith.addf %2, %4 : vector<16x128xf32>
    %cst_5 = arith.constant 0.000000e+00 : f32
    %6 = vector.broadcast %cst_5 : f32 to vector<16x128xf32>
    %7 = arith.maximumf %5, %6 : vector<16x128xf32>
    %8 = arith.truncf %7 : vector<16x128xf32> to vector<16x128xbf16>
    %c0_6 = arith.constant 0 : index
    %c0_7 = arith.constant 0 : index
    %9 = vector.load %arg4[%c0_6, %c0_7] : memref<128x128xbf16, #tpu.memory_space<vmem>>, vector<128x128xbf16>
    %cst_8 = arith.constant dense<0.000000e+00> : vector<16x128xf32>
    %10 = tpu.matmul %8, %9, %cst_8 {dimension_numbers = #tpu.dot_dimension_numbers<[1], [0], [0], [1], [0, 0, 1, 1], [], []>} : vector<16x128xbf16>, vector<128x128xbf16>, vector<16x128xf32> -> vector<16x128xf32>
    %c0_9 = arith.constant 0 : index
    %c0_10 = arith.constant 0 : index
    %11 = vector.load %arg5[%c0_9, %c0_10] : memref<1x128xf32, #tpu.memory_space<vmem>>, vector<1x128xf32>
    %12 = vector.broadcast %11 : vector<1x128xf32> to vector<16x128xf32>
    %13 = arith.addf %10, %12 : vector<16x128xf32>
    %c0_11 = arith.constant 0 : index
    %c0_12 = arith.constant 0 : index
    %14 = vector.load %arg6[%c0_11, %c0_12] : memref<16x128xf32, #tpu.memory_space<vmem>>, vector<16x128xf32>
    tpu.vector_store %arg6[%c0_11, %c0_12], %13 {strides = array<i32>} : memref<16x128xf32, #tpu.memory_space<vmem>>, vector<16x128xf32>,
    return
  }
  func.func @transform_0(%arg0: i32) -> (i32, i32) {
    %c0_i32 = arith.constant 0 : i32
    %c0_i32_0 = arith.constant 0 : i32
    return %arg0, %c0_i32 : i32, i32
  }
  func.func @transform_1(%arg0: i32) -> (i32, i32) {
    %c0_i32 = arith.constant 0 : i32
    %c0_i32_0 = arith.constant 0 : i32
    %c0_i32_1 = arith.constant 0 : i32
    return %c0_i32, %c0_i32_0 : i32, i32
  }
  func.func @transform_2(%arg0: i32) -> (i32, i32) {
    %c0_i32 = arith.constant 0 : i32
    %c0_i32_0 = arith.constant 0 : i32
    %c0_i32_1 = arith.constant 0 : i32
    return %c0_i32, %c0_i32_0 : i32, i32
  }
  func.func @transform_3(%arg0: i32) -> (i32, i32) {
    %c0_i32 = arith.constant 0 : i32
    %c0_i32_0 = arith.constant 0 : i32
    %c0_i32_1 = arith.constant 0 : i32
    return %c0_i32, %c0_i32_0 : i32, i32
  }
  func.func @transform_4(%arg0: i32) -> (i32, i32) {
    %c0_i32 = arith.constant 0 : i32
    %c0_i32_0 = arith.constant 0 : i32
    %c0_i32_1 = arith.constant 0 : i32
    return %c0_i32, %c0_i32_0 : i32, i32
  }
  func.func @transform_5(%arg0: i32) -> (i32, i32) {
    %c0_i32 = arith.constant 0 : i32
    %c0_i32_0 = arith.constant 0 : i32
    return %arg0, %c0_i32 : i32, i32
  }
}

module attributes {stable_mosaic.version = 11 : i64} {
  func.func @_fused_body_heads_kernel(%arg0: i32, %arg1: memref<16x32xbf16, #tpu.memory_space<vmem>>, %arg2: memref<32x128xbf16, #tpu.memory_space<vmem>>, %arg3: memref<1x128xf32, #tpu.memory_space<vmem>>, %arg4: memref<128x128xbf16, #tpu.memory_space<vmem>>, %arg5: memref<1x128xf32, #tpu.memory_space<vmem>>, %arg6: memref<16x128xf32, #tpu.memory_space<vmem>>) attributes {dimension_semantics = [#tpu.dimension_semantics<parallel>], iteration_bounds = array<i64: 2>, scalar_prefetch = 0 : i64, scratch_operands = 0 : i64, tpu.core_type = #tpu.core_type<tc>, window_params = [{transform_indices = @transform_0, window_bounds = array<i64: 16, 32>}, {pipeline_mode = #tpu.pipeline_mode<synchronous>, transform_indices = @transform_1, window_bounds = array<i64: 32, 128>}, {pipeline_mode = #tpu.pipeline_mode<synchronous>, transform_indices = @transform_2, window_bounds = array<i64: 1, 128>}, {pipeline_mode = #tpu.pipeline_mode<synchronous>, transform_indices = @transform_3, window_bounds = array<i64: 128, 128>}, {pipeline_mode = #tpu.pipeline_mode<synchronous>, transform_indices = @transform_4, window_bounds = array<i64: 1, 128>}, {transform_indices = @transform_5, window_bounds = array<i64: 16, 128>}]} {
    %c0 = arith.constant 0 : index
    %c0_0 = arith.constant 0 : index
    %0 = vector.load %arg1[%c0, %c0_0] : memref<16x32xbf16, #tpu.memory_space<vmem>>, vector<16x32xbf16>
    %c0_1 = arith.constant 0 : index
    %c0_2 = arith.constant 0 : index
    %1 = vector.load %arg2[%c0_1, %c0_2] : memref<32x128xbf16, #tpu.memory_space<vmem>>, vector<32x128xbf16>
    %cst = arith.constant dense<0.000000e+00> : vector<16x128xf32>
    %2 = tpu.matmul %0, %1, %cst {dimension_numbers = #tpu.dot_dimension_numbers<[1], [0], [0], [1], [0, 0, 1, 1], [], []>} : vector<16x32xbf16>, vector<32x128xbf16>, vector<16x128xf32> -> vector<16x128xf32>
    %c0_3 = arith.constant 0 : index
    %c0_4 = arith.constant 0 : index
    %3 = vector.load %arg3[%c0_3, %c0_4] : memref<1x128xf32, #tpu.memory_space<vmem>>, vector<1x128xf32>
    %4 = vector.broadcast %3 : vector<1x128xf32> to vector<16x128xf32>
    %5 = arith.addf %2, %4 : vector<16x128xf32>
    %cst_5 = arith.constant 0.000000e+00 : f32
    %6 = vector.broadcast %cst_5 : f32 to vector<16x128xf32>
    %7 = arith.maximumf %5, %6 : vector<16x128xf32>
    %8 = arith.truncf %7 : vector<16x128xf32> to vector<16x128xbf16>
    %c0_6 = arith.constant 0 : index
    %c0_7 = arith.constant 0 : index
    %9 = vector.load %arg4[%c0_6, %c0_7] : memref<128x128xbf16, #tpu.memory_space<vmem>>, vector<128x128xbf16>
    %cst_8 = arith.constant dense<0.000000e+00> : vector<16x128xf32>
    %10 = tpu.matmul %8, %9, %cst_8 {dimension_numbers = #tpu.dot_dimension_numbers<[1], [0], [0], [1], [0, 0, 1, 1], [], []>} : vector<16x128xbf16>, vector<128x128xbf16>, vector<16x128xf32> -> vector<16x128xf32>
    %c0_9 = arith.constant 0 : index
    %c0_10 = arith.constant 0 : index
    %11 = vector.load %arg5[%c0_9, %c0_10] : memref<1x128xf32, #tpu.memory_space<vmem>>, vector<1x128xf32>
    %12 = vector.broadcast %11 : vector<1x128xf32> to vector<16x128xf32>
    %13 = arith.addf %10, %12 : vector<16x128xf32>
    %c0_11 = arith.constant 0 : index
    %c0_12 = arith.constant 0 : index
    %14 = vector.load %arg6[%c0_11, %c0_12] : memref<16x128xf32, #tpu.memory_space<vmem>>, vector<16x128xf32>
    tpu.vector_store %arg6[%c0_11, %c0_12], %13 {strides = array<i32>} : memref<16x128xf32, #tpu.memory_space<vmem>>, vector<16x128xf32>,
    return
  }
  func.func @transform_0(%arg0: i32) -> (i32, i32) {
    %c0_i32 = arith.constant 0 : i32
    %c0_i32_0 = arith.constant 0 : i32
    return %arg0, %c0_i32 : i32, i32
  }
  func.func @transform_1(%arg0: i32) -> (i32, i32) {
    %c0_i32 = arith.constant 0 : i32
    %c0_i32_0 = arith.constant 0 : i32
    %c0_i32_1 = arith.constant 0 : i32
    return %c0_i32, %c0_i32_0 : i32, i32
  }
  func.func @transform_2(%arg0: i32) -> (i32, i32) {
    %c0_i32 = arith.constant 0 : i32
    %c0_i32_0 = arith.constant 0 : i32
    %c0_i32_1 = arith.constant 0 : i32
    return %c0_i32, %c0_i32_0 : i32, i32
  }
  func.func @transform_3(%arg0: i32) -> (i32, i32) {
    %c0_i32 = arith.constant 0 : i32
    %c0_i32_0 = arith.constant 0 : i32
    %c0_i32_1 = arith.constant 0 : i32
    return %c0_i32, %c0_i32_0 : i32, i32
  }
  func.func @transform_4(%arg0: i32) -> (i32, i32) {
    %c0_i32 = arith.constant 0 : i32
    %c0_i32_0 = arith.constant 0 : i32
    %c0_i32_1 = arith.constant 0 : i32
    return %c0_i32, %c0_i32_0 : i32, i32
  }
  func.func @transform_5(%arg0: i32) -> (i32, i32) {
    %c0_i32 = arith.constant 0 : i32
    %c0_i32_0 = arith.constant 0 : i32
    return %arg0, %c0_i32 : i32, i32
  }
}

</mosaic_0001>

<bundles_post_ra>
// kernel: tpu_custom_call.1
= control target key start
LH: loop header
LB: loop body
LE: loop exit
PB: predicated region body
PF: predicated region fallthrough
CT: control target
= control target key end

     0   :  { %10 = vsyncpa [#allocation3], 0  ;;  %s1125_s0 = inlined_call_operand.hbm [shape: bf16[32,32], index: 0, kind: input, shape index: {}]   ;;  %s1126_s1 = inlined_call_operand.hbm [shape: bf16[32,128], index: 1, kind: input, shape index: {}]   ;;  %s1127_s2 = inlined_call_operand.vmem [shape: f32[1,128], index: 2, kind: input, shape index: {}]   ;;  %s1128_s3 = inlined_call_operand.hbm [shape: bf16[128,128], index: 3, kind: input, shape index: {}]   ;;  %s1129_s4 = inlined_call_operand.vmem [shape: f32[1,128], index: 4, kind: input, shape index: {}]   ;;  %s1130_s5 = inlined_call_operand.hbm [shape: f32[32,128], index: 5, kind: output, shape index: {}]  }
   0x1   :  { %12 = vsyncpa [#allocation3 + $0x1], 0 }
   0x2   :  { %13 = vsyncpa [#allocation6], 0 }
   0x3   :  { %14 = vsyncpa [#allocation4], 0 }
   0x4   :  { %16 = vsyncpa [#allocation4 + $0x1], 0  ;;  %s921_s18 = smov 0   ;;  %s923_s19 = smov 0  }
   0x5   :  { %s925_s20 = smov 0   ;;  %s927_s21 = smov 0  }
   0x6 LB: > { %s942_s22 = sadd.s32 4294967295, %s879_s21   ;;  %s573_s23 = sadd.s32 4294967294, %s879_s21   ;;  %s879_s21 = sphi %s927_s21, %s1153_s21   ;;  %s875_s20 = sphi %s925_s20, %s1152_s20   ;;  %s871_s19 = sphi %s923_s19, %s1151_s19   ;;  %s867_s18 = sphi %s921_s18, %s1150_s18  }
   0x7   : > { %p42_p0 = scmp.ne.s32.totalorder %s871_s19, %s867_s18  ;;  %p1131_p1 = scmp.eq.s32.totalorder %s942_s22, 0 }
   0x8   : > { %p150_p2 = scmp.eq.s32.totalorder %s942_s22, 1  ;;  %p156_p3 = scmp.eq.s32.totalorder %s573_s23, 1 }
   0x9   : > { %p951_p4 = por %p1131_p1, %p42_p0  ;;  %p574_p5 = scmp.ge.s32.totalorder %s879_s21, 1 }
   0xa   : > { %p956_p6 = por %p156_p3, %p42_p0  ;;  %p163_p7 = scmp.lt.s32.totalorder %s879_s21, 3 }
   0xb   : > { %s1136_s24 = scalar_select %p951_p4, 1, 0 }
   0xc   : > { %s1137_s25 = scalar_select %p956_p6, 1, 0 }
   0xd   : > { %p961_p8 = pnand %p574_p5, %p163_p7  ;;  %s881_s27 = smov [#allocation5]  }
   0xe   : > { %s175_s28 = sshll.u32 %s881_s27, 4  ;;  %s882_s30 = smov [#allocation7]   ;;  %s176_s28 = int_to_ptr.vmem [resolvable:$true] %s175_s28 }
   0xf   : > { %s1138_s26 = scalar_select %p961_p8, 1, 0 }
  0x10   : > { %p659_p9 = pneg %p961_p8  ;;  %s191_s6 = sshll.u32 %s882_s30, 4  ;;  %s192_s6 = int_to_ptr.vmem [resolvable:$true] %s191_s6 }
  0x11   : > { %s742_s7 = scalar_lea.vmem %s176_s28, 256  ;;  %p750_p5 = scmp.lt.s32.totalorder %s176_s28, %s176_s28 }
  0x12   : > { %p970_p11 = pnand %p659_p9, %p1131_p1  ;;  %p743_p13 = scmp.ne.s32.totalorder %s176_s28, %s742_s7 }
  0x13   : > { %p751_p7 = scmp.lt.s32.totalorder %s742_s7, %s742_s7 }
  0x14   : > { %p733_p12 = pneg %p970_p11 }
  0x15   : > { %p752_p10 = por %p751_p7, %p750_p5 }
  0x16   : > { %p745_p0 = pnand %p743_p13, %p733_p12 }
  0x18   : > { %p746_p3 = pneg %p745_p0 }
  0x1a   : > { %p753_p9 = pnand %p752_p10, %p746_p3 }
  0x1c   : > { %756 = shalt.err (!%p753_p9)
}
  0x1d   : > { %s1132_s8 = smov 64   ;;  %s884_s9 = smov 4  }
  0x1e   : > { %662 = dma.hbm_to_vmem [thread:$0]  (!%p970_p11), %s1126_s1, 256, %s176_s28, [#allocation6], %s1132_s8, %s1132_s8, %s884_s9  }
  0x1f   : > { %s768_s12 = scalar_lea.vmem %s192_s6, 1024  ;;  %p776_p10 = scmp.lt.s32.totalorder %s192_s6, %s192_s6 }
  0x20   : > { %p769_p13 = scmp.ne.s32.totalorder %s192_s6, %s768_s12  ;;  %p777_p3 = scmp.lt.s32.totalorder %s768_s12, %s768_s12 }
  0x22   : > { %p771_p0 = pnand %p769_p13, %p733_p12  ;;  %p778_p7 = por %p777_p3, %p776_p10 }
  0x24   : > { %p772_p5 = pneg %p771_p0 }
  0x26   : > { %p779_p9 = pnand %p778_p7, %p772_p5 }
  0x28   : > { %782 = shalt.err (!%p779_p9)
}
  0x29   : > { %665 = dma.hbm_to_vmem [thread:$0]  (!%p970_p11), %s1128_s3, 1024, %s192_s6, [#allocation6], %s1132_s8, %s1132_s8, %s884_s9  }
  0x2a   : > { %s999_s15 = sadd.s32 1, %s879_s21   ;;  %s29_s16 = sadd.s32 1, %s875_s20 }
  0x2b   : > { %s26_s17 = ssub.s32 %s879_s21, %s999_s15  ;;  %p36_p12 = scmp.ne.s32.totalorder %s875_s20, %s871_s19 }
  0x2c   : > { %p27_p13 = scmp.eq.s32.totalorder %s26_s17, 0  ;;  %p37_p0 = scmp.eq.s32.totalorder %s879_s21, 0 }
  0x2d   : > { %p1009_p5 = por %p150_p2, %p36_p12  ;;  %p676_p10 = scmp.lt.s32.totalorder %s879_s21, 2 }
  0x2e   : > { %s1015_s27 = scalar_select %p27_p13, %s875_s20, %s29_s16  }
  0x2f   : > { %s1140_s23 = scalar_select %p1009_p5, 1, 0 }
  0x30   : > { %p38_p3 = por %p37_p0, %p36_p12  ;;  %s208_s28 = sand.u32 1, %s875_s20  }
  0x31   : > { %s578_s29 = sshll.u32 %s208_s28, 3  ;;  %s605_s30 = sshll.u32 %s879_s21, 7 }
  0x32   : > { %s1022_s10 = scalar_lea.hbm %s1125_s0, %s605_s30  ;;  %s212_s11 = scalar_lea.vmem [#allocation2], %s578_s29 }
  0x33   : > { %s219_s12 = sshll.u32 %s212_s11, 4  ;;  %p1026_p2 = pnand %p676_p10, %p38_p3  ;;  %s1024_s12 = int_to_ptr.vmem [resolvable:$true] %s219_s12 }
  0x34   : > { %s1030_s14 = scalar_lea.sflag [#allocation3], %s208_s28  ;;  %s783_s16 = scalar_lea.hbm %s1022_s10, 128 }
  0x35   : > { %p784_p11 = scmp.ne.s32.totalorder %s1022_s10, %s783_s16  ;;  %p785_p7 = pneg %p1026_p2 }
  0x36   : > { %s788_s29 = scalar_lea.hbm %s1125_s0, 256  ;;  %p789_p13 = scmp.lt.s32.totalorder %s1022_s10, %s1125_s0 }
  0x37   : > { %p786_p9 = pnand %p785_p7, %p784_p11  ;;  %p790_p0 = scmp.lt.s32.totalorder %s788_s29, %s783_s16 }
  0x39   : > { %p787_p12 = pneg %p786_p9  ;;  %p791_p10 = por %p790_p0, %p789_p13 }
  0x3b   : > { %p792_p3 = pnand %p791_p10, %p787_p12 }
  0x3d   : > { %795 = shalt.err (!%p792_p3)
}
  0x3e   : > { %s796_s28 = scalar_lea.vmem %s1024_s12, 128  ;;  %s885_s11 = smov [#allocation2]  }
  0x3f   : > { %p797_p1 = scmp.ne.s32.totalorder %s1024_s12, %s796_s28  ;;  %s801_s8 = sshll.u32 %s885_s11, 4  ;;  %s802_s8 = int_to_ptr.vmem [resolvable:$false] %s801_s8 }
  0x40   : > { %s803_s17 = scalar_lea.vmem %s802_s8, 256  ;;  %p804_p9 = scmp.lt.s32.totalorder %s1024_s12, %s802_s8 }
  0x41   : > { %p799_p6 = pnand %p797_p1, %p785_p7  ;;  %p805_p5 = scmp.lt.s32.totalorder %s803_s17, %s796_s28 }
  0x43   : > { %p800_p11 = pneg %p799_p6  ;;  %p806_p4 = por %p805_p5, %p804_p9 }
  0x45   : > { %p807_p8 = pnand %p806_p4, %p800_p11 }
  0x47   : > { %810 = shalt.err (!%p807_p8)
}
  0x48   : > { %s1142_s16 = smov 64   ;;  %p1143_p1 = scmp.ne.s32.totalorder %s1138_s26, 0 }
  0x49   : > { %669 = dma.hbm_to_vmem [thread:$0]  (!%p1026_p2), %s1022_s10, 128, %s1024_s12, %s1030_s14, %s1142_s16, %s1142_s16, %s884_s9  }
  0x4a   : > { %231 = sbr.rel (%p1143_p1) target bundleno = 509 (0x1fd), region = 40  ;;  %s1057_s30 = sand.u32 (!%p1143_p1), 1, %s871_s19  }
  0x4b   : > { %s582_s8 = sshll.u32 (!%p1143_p1), %s1057_s30, 3  ;;  %s234_s29 = scalar_lea.sflag (!%p1143_p1), [#allocation3], %s1057_s30 }
  0x4c   : > { %s237_s6 = scalar_lea.vmem (!%p1143_p1), [#allocation2], %s582_s8  ;;  %p1144_p4 = scmp.ne.s32.totalorder (!%p1143_p1), %s1136_s24, 0 }
  0x4f   : > { %854 = dma.done.wait (%p1144_p4), %s234_s29, 128  }
  0x50   : > { %856 = vsyncadd (%p1144_p4), %s234_s29, 4294967168  ;;  %p1145_p6 = scmp.eq.s32.totalorder %s942_s22, 0 }
  0x52   : > { %858 = dma.done.wait (%p1145_p6), [#allocation6], 1280   ;;  %p1146_p8 = pmov %p1145_p6 }
  0x53   : > { %v886_v0 = vmov 0.0   ;;  %vm887_vm0 = vmmov 0   ;;  %v720_v1 = vld [vmem:[#allocation5 + $0x8] sm:$0xff]   ;;  %v721_v2 = vld [vmem:[#allocation5] sm:$0xff]   ;;  %v722_v4 = vld [vmem:[%s237_s6] sm:$0xff]   ;;  %vm305_vm1 = vcmask 261120  }
  0x54   : > { %860 = vsyncadd (%p1146_p8), [#allocation6], 4294966016  ;;  %619 = vmatprep.subr.bf16.mxu0 %v886_v0  ;;  %623 = vmatprep.mubr.msk.bf16.mxu0 %vm887_vm0, %v886_v0  ;;  %v723_v3 = vld [vmem:[#allocation7 + $0x38] sm:$0xff]   ;;  %v724_v5 = vld [vmem:[#allocation7 + $0x30] sm:$0xff]   ;;  %s585_s9 = sshll.u32 %s1057_s30, 4  ;;  %s606_s7 = sshll.u32 %s942_s22, 8 }
  0x55   : > { %627 = vmatprep.subr.bf16.mxu1 %v886_v0  ;;  %643 = vmatprep.mubr.msk.bf16.mxu1 %vm887_vm0, %v886_v0  ;;  %v725_v6 = vld [vmem:[#allocation7 + $0x28] sm:$0xff]   ;;  %v726_v7 = vld [vmem:[#allocation7 + $0x20] sm:$0xff]   ;;  %v727_v8 = vld [vmem:[#allocation7 + $0x18] sm:$0xff]   ;;  %s271_s13 = scalar_lea.vmem [#allocation8], %s585_s9  ;;  %s1082_s17 = scalar_lea.hbm %s1130_s5, %s606_s7 }
  0x56   : > { %620 = vmatpush3.bf16.msra.mxu0 %v720_v1  ;;  %628 = vmatpush3.bf16.msra.mxu1 %v723_v3  ;;  %v728_v9 = vld [vmem:[#allocation7 + $0x10] sm:$0xff]   ;;  %v729_v10 = vld [vmem:[#allocation7 + $0x8] sm:$0xff]   ;;  %v730_v11 = vld [vmem:[#allocation7] sm:$0xff]   ;;  %s481_s14 = sshll.u32 %s271_s13, 4  ;;  %s468_s16 = scalar_lea.sflag [#allocation4], %s1057_s30  ;;  %s1077_s14 = int_to_ptr.vmem [resolvable:$true] %s481_s14 }
  0x57   : > { %621 = vmatprep.subr.bf16.mxu0 %v886_v0  ;;  %629 = vmatprep.subr.bf16.mxu1 %v886_v0  ;;  %v586_v12 = vld [vmem:[%s1127_s2] ss:$0 sm:$0xff]  ;;  %s811_s8 = scalar_lea.vmem %s1077_s14, 256  ;;  %p1147_p2 = scmp.ne.s32.totalorder %s1140_s23, 0 }
  0x58   : > { %v591_v22 = vld [vmem:[%s1129_s4] ss:$0 sm:$0xff]  ;;  %p812_p5 = scmp.ne.s32.totalorder %s1077_s14, %s811_s8  ;;  %s888_s22 = smov [#allocation8]  }
  0x59   : > { %s815_s29 = sshll.u32 %s888_s22, 4  ;;  %s816_s29 = int_to_ptr.vmem [resolvable:$false] %s815_s29 }
  0x5a   : > { %622 = vmatpush3.bf16.msra.mxu0 %v721_v2  ;;  %630 = vmatpush3.bf16.msra.mxu1 %v724_v5  ;;  %p813_p7 = pnand %p812_p5, %p1147_p2  ;;  %s817_s6 = scalar_lea.vmem %s816_s29, 512 }
  0x5b   : > { %631 = vmatprep.subr.bf16.mxu1 %v886_v0  ;;  %p818_p13 = scmp.lt.s32.totalorder %s1077_s14, %s816_s29  ;;  %p819_p0 = scmp.lt.s32.totalorder %s817_s6, %s811_s8 }
  0x5c   : > { %p814_p12 = pneg %p813_p7 }
  0x5d   : > { %624 = vmatmul.mubr.msk.bf16.vlgmr.msra.gmra.mxu0 %vm305_vm1, %v722_v4  ;;  %p820_p10 = por %p819_p0, %p818_p13 }
  0x5e   : > { %632 = vmatpush3.bf16.msra.mxu1 %v725_v6 }
  0x5f   : > { %633 = vmatprep.subr.bf16.mxu1 %v886_v0  ;;  %p821_p3 = pnand %p820_p10, %p814_p12 }
  0x62   : > { %634 = vmatpush3.bf16.msra.mxu1 %v726_v7 }
  0x63   : > { %635 = vmatprep.subr.bf16.mxu1 %v886_v0 }
  0x66   : > { %636 = vmatpush3.bf16.msra.mxu1 %v727_v8 }
  0x67   : > { %637 = vmatprep.subr.bf16.mxu1 %v886_v0 }
  0x6a   : > { %638 = vmatpush3.bf16.msra.mxu1 %v728_v9 }
  0x6b   : > { %639 = vmatprep.subr.bf16.mxu1 %v886_v0 }
  0x6e   : > { %640 = vmatpush3.bf16.msra.mxu1 %v729_v10 }
  0x6f   : > { %641 = vmatprep.subr.bf16.mxu1 %v886_v0 }
  0x72   : > { %642 = vmatpush3.bf16.msra.mxu1 %v730_v11 }
 0x11d   : > { %v343_v13 = vpop.f32.mrf.mxu0 }
 0x11e   : > { %v344_v15 = vadd.f32 %v586_v12, %v343_v13 }
 0x11f   : > { %v625_v14 = vpop.f32.mrf.mxu0 }
 0x120   : > { %v350_v19 = vmax.f32 %v344_v15, 0.0 }
 0x121   : > { %v346_v16 = vpop.f32.mrf.mxu0 }
 0x122   : > { %v347_v17 = vadd.f32 %v586_v12, %v346_v16 }
 0x123   : > { %v626_v18 = vpop.f32.mrf.mxu0 }
 0x124   : > { %v351_v20 = vmax.f32 %v347_v17, 0.0 }
 0x126   : > { %v352_v21 = vpack.c.bf16 %v351_v20, %v350_v19 }
 0x128   : > { %644 = vmatmul.mubr.bf16.vlgmr.msra.gmra.mxu1 %v352_v21 }
 0x1e8   : > { %v458_v23 = vpop.f32.mrf.mxu1 }
 0x1e9   : > { %v459_v24 = vadd.f32 %v591_v22, %v458_v23 }
 0x1ea   : > { %v645_v25 = vpop.f32.mrf.mxu1 }
 0x1eb   : > { %465 = vst [vmem:[%s271_s13] sm:$0xff] %v459_v24 }
 0x1ec   : > { %v461_v26 = vpop.f32.mrf.mxu1 }
 0x1ed   : > { %v462_v27 = vadd.f32 %v591_v22, %v461_v26 }
 0x1ee   : > { %v646_v28 = vpop.f32.mrf.mxu1 }
 0x1ef   : > { %466 = vst [vmem:[%s271_s13 + $0x8] sm:$0xff] %v462_v27 }
 0x1f0   : > { %824 = shalt.err (!%p821_p3)
}
 0x1f1   : > { %s825_s24 = scalar_lea.hbm %s1082_s17, 256  ;;  %s829_s10 = scalar_lea.hbm %s1130_s5, 512 }
 0x1f2   : > { %p826_p11 = scmp.ne.s32.totalorder %s1082_s17, %s825_s24  ;;  %p830_p4 = scmp.lt.s32.totalorder %s1082_s17, %s1130_s5 }
 0x1f3   : > { %p831_p6 = scmp.lt.s32.totalorder %s829_s10, %s825_s24 }
 0x1f4   : > { %p827_p9 = pnand %p826_p11, %p1147_p2 }
 0x1f5   : > { %p832_p8 = por %p831_p6, %p830_p4 }
 0x1f6   : > { %p828_p1 = pneg %p827_p9 }
 0x1f8   : > { %p833_p5 = pnand %p832_p8, %p828_p1 }
 0x1fa   : > { %836 = shalt.err (!%p833_p5)
}
 0x1fb   : > { %s889_s7 = smov 128   ;;  %s890_s28 = smov 8  }
 0x1fc   : > { %657 = dma.vmem_to_hbm [thread:$0]  (%p1147_p2), %s1077_s14, 256, %s1082_s17, %s468_s16, %s889_s7, %s889_s7, %s890_s28  }
 0x1fd PF: > { %s496_s11 = sand.u32 1, %s867_s18   ;;  %p1148_p7 = scmp.ne.s32.totalorder %s1137_s25, 0 }
 0x1fe   : > { %p1149_p12 = scmp.ge.s32.totalorder %s879_s21, 2  ;;  %s497_s8 = scalar_lea.sflag [#allocation4], %s496_s11 }
 0x200   : > { %p671_p13 = pnand %p1149_p12, %p1148_p7 }
 0x202   : > { %p672_p0 = pneg %p671_p13 }
 0x204   : > { %862 = dma.done.wait (%p672_p0), %s497_s8, 256  }
 0x205   : > { %864 = vsyncadd (%p672_p0), %s497_s8, 4294967040  ;;  %p19_p10 = scmp.ge.s32.totalorder %s999_s15, 4   ;;  %s1150_s18 = smov %s871_s19 }
 0x206   : > { %s1151_s19 = smov %s875_s20  ;;  %s1152_s20 = smov %s1015_s27 }
 0x207   : > { %s1153_s21 = smov %s999_s15  ;;  %21 = sbr.rel (!%p19_p10) target bundleno = 6 (0x6), region = 93 }
 0x20c   :  { %502 = vsyncpa [#allocation3], 1 }
 0x20d   :  { %504 = vsyncpa [#allocation3 + $0x1], 1 }
 0x20e   :  { %505 = vsyncpa [#allocation6], 1 }
 0x20f   :  { %506 = vsyncpa [#allocation4], 1 }
 0x210   :  { %508 = vsyncpa [#allocation4 + $0x1], 1 }

// kernel: tpu_custom_call.1
= control target key start
LH: loop header
LB: loop body
LE: loop exit
PB: predicated region body
PF: predicated region fallthrough
CT: control target
= control target key end

     0   :  { %10 = vsyncpa [#allocation3], 0  ;;  %s1125_s0 = inlined_call_operand.hbm [shape: bf16[32,32], index: 0, kind: input, shape index: {}]   ;;  %s1126_s1 = inlined_call_operand.hbm [shape: bf16[32,128], index: 1, kind: input, shape index: {}]   ;;  %s1127_s2 = inlined_call_operand.vmem [shape: f32[1,128], index: 2, kind: input, shape index: {}]   ;;  %s1128_s3 = inlined_call_operand.hbm [shape: bf16[128,128], index: 3, kind: input, shape index: {}]   ;;  %s1129_s4 = inlined_call_operand.vmem [shape: f32[1,128], index: 4, kind: input, shape index: {}]   ;;  %s1130_s5 = inlined_call_operand.hbm [shape: f32[32,128], index: 5, kind: output, shape index: {}]  }
   0x1   :  { %12 = vsyncpa [#allocation3 + $0x1], 0 }
   0x2   :  { %13 = vsyncpa [#allocation6], 0 }
   0x3   :  { %14 = vsyncpa [#allocation4], 0 }
   0x4   :  { %16 = vsyncpa [#allocation4 + $0x1], 0  ;;  %s921_s18 = smov 0   ;;  %s923_s19 = smov 0  }
   0x5   :  { %s925_s20 = smov 0   ;;  %s927_s21 = smov 0  }
   0x6 LB: > { %s942_s22 = sadd.s32 4294967295, %s879_s21   ;;  %s573_s23 = sadd.s32 4294967294, %s879_s21   ;;  %s879_s21 = sphi %s927_s21, %s1153_s21   ;;  %s875_s20 = sphi %s925_s20, %s1152_s20   ;;  %s871_s19 = sphi %s923_s19, %s1151_s19   ;;  %s867_s18 = sphi %s921_s18, %s1150_s18  }
   0x7   : > { %p42_p0 = scmp.ne.s32.totalorder %s871_s19, %s867_s18  ;;  %p1131_p1 = scmp.eq.s32.totalorder %s942_s22, 0 }
   0x8   : > { %p150_p2 = scmp.eq.s32.totalorder %s942_s22, 1  ;;  %p156_p3 = scmp.eq.s32.totalorder %s573_s23, 1 }
   0x9   : > { %p951_p4 = por %p1131_p1, %p42_p0  ;;  %p574_p5 = scmp.ge.s32.totalorder %s879_s21, 1 }
   0xa   : > { %p956_p6 = por %p156_p3, %p42_p0  ;;  %p163_p7 = scmp.lt.s32.totalorder %s879_s21, 3 }
   0xb   : > { %s1136_s24 = scalar_select %p951_p4, 1, 0 }
   0xc   : > { %s1137_s25 = scalar_select %p956_p6, 1, 0 }
   0xd   : > { %p961_p8 = pnand %p574_p5, %p163_p7  ;;  %s881_s27 = smov [#allocation5]  }
   0xe   : > { %s175_s28 = sshll.u32 %s881_s27, 4  ;;  %s882_s30 = smov [#allocation7]   ;;  %s176_s28 = int_to_ptr.vmem [resolvable:$true] %s175_s28 }
   0xf   : > { %s1138_s26 = scalar_select %p961_p8, 1, 0 }
  0x10   : > { %p659_p9 = pneg %p961_p8  ;;  %s191_s6 = sshll.u32 %s882_s30, 4  ;;  %s192_s6 = int_to_ptr.vmem [resolvable:$true] %s191_s6 }
  0x11   : > { %s742_s7 = scalar_lea.vmem %s176_s28, 256  ;;  %p750_p5 = scmp.lt.s32.totalorder %s176_s28, %s176_s28 }
  0x12   : > { %p970_p11 = pnand %p659_p9, %p1131_p1  ;;  %p743_p13 = scmp.ne.s32.totalorder %s176_s28, %s742_s7 }
  0x13   : > { %p751_p7 = scmp.lt.s32.totalorder %s742_s7, %s742_s7 }
  0x14   : > { %p733_p12 = pneg %p970_p11 }
  0x15   : > { %p752_p10 = por %p751_p7, %p750_p5 }
  0x16   : > { %p745_p0 = pnand %p743_p13, %p733_p12 }
  0x18   : > { %p746_p3 = pneg %p745_p0 }
  0x1a   : > { %p753_p9 = pnand %p752_p10, %p746_p3 }
  0x1c   : > { %756 = shalt.err (!%p753_p9)
}
  0x1d   : > { %s1132_s8 = smov 64   ;;  %s884_s9 = smov 4  }
  0x1e   : > { %662 = dma.hbm_to_vmem [thread:$0]  (!%p970_p11), %s1126_s1, 256, %s176_s28, [#allocation6], %s1132_s8, %s1132_s8, %s884_s9  }
  0x1f   : > { %s768_s12 = scalar_lea.vmem %s192_s6, 1024  ;;  %p776_p10 = scmp.lt.s32.totalorder %s192_s6, %s192_s6 }
  0x20   : > { %p769_p13 = scmp.ne.s32.totalorder %s192_s6, %s768_s12  ;;  %p777_p3 = scmp.lt.s32.totalorder %s768_s12, %s768_s12 }
  0x22   : > { %p771_p0 = pnand %p769_p13, %p733_p12  ;;  %p778_p7 = por %p777_p3, %p776_p10 }
  0x24   : > { %p772_p5 = pneg %p771_p0 }
  0x26   : > { %p779_p9 = pnand %p778_p7, %p772_p5 }
  0x28   : > { %782 = shalt.err (!%p779_p9)
}
  0x29   : > { %665 = dma.hbm_to_vmem [thread:$0]  (!%p970_p11), %s1128_s3, 1024, %s192_s6, [#allocation6], %s1132_s8, %s1132_s8, %s884_s9  }
  0x2a   : > { %s999_s15 = sadd.s32 1, %s879_s21   ;;  %s29_s16 = sadd.s32 1, %s875_s20 }
  0x2b   : > { %s26_s17 = ssub.s32 %s879_s21, %s999_s15  ;;  %p36_p12 = scmp.ne.s32.totalorder %s875_s20, %s871_s19 }
  0x2c   : > { %p27_p13 = scmp.eq.s32.totalorder %s26_s17, 0  ;;  %p37_p0 = scmp.eq.s32.totalorder %s879_s21, 0 }
  0x2d   : > { %p1009_p5 = por %p150_p2, %p36_p12  ;;  %p676_p10 = scmp.lt.s32.totalorder %s879_s21, 2 }
  0x2e   : > { %s1015_s27 = scalar_select %p27_p13, %s875_s20, %s29_s16  }
  0x2f   : > { %s1140_s23 = scalar_select %p1009_p5, 1, 0 }
  0x30   : > { %p38_p3 = por %p37_p0, %p36_p12  ;;  %s208_s28 = sand.u32 1, %s875_s20  }
  0x31   : > { %s578_s29 = sshll.u32 %s208_s28, 3  ;;  %s605_s30 = sshll.u32 %s879_s21, 7 }
  0x32   : > { %s1022_s10 = scalar_lea.hbm %s1125_s0, %s605_s30  ;;  %s212_s11 = scalar_lea.vmem [#allocation2], %s578_s29 }
  0x33   : > { %s219_s12 = sshll.u32 %s212_s11, 4  ;;  %p1026_p2 = pnand %p676_p10, %p38_p3  ;;  %s1024_s12 = int_to_ptr.vmem [resolvable:$true] %s219_s12 }
  0x34   : > { %s1030_s14 = scalar_lea.sflag [#allocation3], %s208_s28  ;;  %s783_s16 = scalar_lea.hbm %s1022_s10, 128 }
  0x35   : > { %p784_p11 = scmp.ne.s32.totalorder %s1022_s10, %s783_s16  ;;  %p785_p7 = pneg %p1026_p2 }
  0x36   : > { %s788_s29 = scalar_lea.hbm %s1125_s0, 256  ;;  %p789_p13 = scmp.lt.s32.totalorder %s1022_s10, %s1125_s0 }
  0x37   : > { %p786_p9 = pnand %p785_p7, %p784_p11  ;;  %p790_p0 = scmp.lt.s32.totalorder %s788_s29, %s783_s16 }
  0x39   : > { %p787_p12 = pneg %p786_p9  ;;  %p791_p10 = por %p790_p0, %p789_p13 }
  0x3b   : > { %p792_p3 = pnand %p791_p10, %p787_p12 }
  0x3d   : > { %795 = shalt.err (!%p792_p3)
}
  0x3e   : > { %s796_s28 = scalar_lea.vmem %s1024_s12, 128  ;;  %s885_s11 = smov [#allocation2]  }
  0x3f   : > { %p797_p1 = scmp.ne.s32.totalorder %s1024_s12, %s796_s28  ;;  %s801_s8 = sshll.u32 %s885_s11, 4  ;;  %s802_s8 = int_to_ptr.vmem [resolvable:$false] %s801_s8 }
  0x40   : > { %s803_s17 = scalar_lea.vmem %s802_s8, 256  ;;  %p804_p9 = scmp.lt.s32.totalorder %s1024_s12, %s802_s8 }
  0x41   : > { %p799_p6 = pnand %p797_p1, %p785_p7  ;;  %p805_p5 = scmp.lt.s32.totalorder %s803_s17, %s796_s28 }
  0x43   : > { %p800_p11 = pneg %p799_p6  ;;  %p806_p4 = por %p805_p5, %p804_p9 }
  0x45   : > { %p807_p8 = pnand %p806_p4, %p800_p11 }
  0x47   : > { %810 = shalt.err (!%p807_p8)
}
  0x48   : > { %s1142_s16 = smov 64   ;;  %p1143_p1 = scmp.ne.s32.totalorder %s1138_s26, 0 }
  0x49   : > { %669 = dma.hbm_to_vmem [thread:$0]  (!%p1026_p2), %s1022_s10, 128, %s1024_s12, %s1030_s14, %s1142_s16, %s1142_s16, %s884_s9  }
  0x4a   : > { %231 = sbr.rel (%p1143_p1) target bundleno = 509 (0x1fd), region = 40  ;;  %s1057_s30 = sand.u32 (!%p1143_p1), 1, %s871_s19  }
  0x4b   : > { %s582_s8 = sshll.u32 (!%p1143_p1), %s1057_s30, 3  ;;  %s234_s29 = scalar_lea.sflag (!%p1143_p1), [#allocation3], %s1057_s30 }
  0x4c   : > { %s237_s6 = scalar_lea.vmem (!%p1143_p1), [#allocation2], %s582_s8  ;;  %p1144_p4 = scmp.ne.s32.totalorder (!%p1143_p1), %s1136_s24, 0 }
  0x4f   : > { %854 = dma.done.wait (%p1144_p4), %s234_s29, 128  }
  0x50   : > { %856 = vsyncadd (%p1144_p4), %s234_s29, 4294967168  ;;  %p1145_p6 = scmp.eq.s32.totalorder %s942_s22, 0 }
  0x52   : > { %858 = dma.done.wait (%p1145_p6), [#allocation6], 1280   ;;  %p1146_p8 = pmov %p1145_p6 }
  0x53   : > { %v886_v0 = vmov 0.0   ;;  %vm887_vm0 = vmmov 0   ;;  %v720_v1 = vld [vmem:[#allocation5 + $0x8] sm:$0xff]   ;;  %v721_v2 = vld [vmem:[#allocation5] sm:$0xff]   ;;  %v722_v4 = vld [vmem:[%s237_s6] sm:$0xff]   ;;  %vm305_vm1 = vcmask 261120  }
  0x54   : > { %860 = vsyncadd (%p1146_p8), [#allocation6], 4294966016  ;;  %619 = vmatprep.subr.bf16.mxu0 %v886_v0  ;;  %623 = vmatprep.mubr.msk.bf16.mxu0 %vm887_vm0, %v886_v0  ;;  %v723_v3 = vld [vmem:[#allocation7 + $0x38] sm:$0xff]   ;;  %v724_v5 = vld [vmem:[#allocation7 + $0x30] sm:$0xff]   ;;  %s585_s9 = sshll.u32 %s1057_s30, 4  ;;  %s606_s7 = sshll.u32 %s942_s22, 8 }
  0x55   : > { %627 = vmatprep.subr.bf16.mxu1 %v886_v0  ;;  %643 = vmatprep.mubr.msk.bf16.mxu1 %vm887_vm0, %v886_v0  ;;  %v725_v6 = vld [vmem:[#allocation7 + $0x28] sm:$0xff]   ;;  %v726_v7 = vld [vmem:[#allocation7 + $0x20] sm:$0xff]   ;;  %v727_v8 = vld [vmem:[#allocation7 + $0x18] sm:$0xff]   ;;  %s271_s13 = scalar_lea.vmem [#allocation8], %s585_s9  ;;  %s1082_s17 = scalar_lea.hbm %s1130_s5, %s606_s7 }
  0x56   : > { %620 = vmatpush3.bf16.msra.mxu0 %v720_v1  ;;  %628 = vmatpush3.bf16.msra.mxu1 %v723_v3  ;;  %v728_v9 = vld [vmem:[#allocation7 + $0x10] sm:$0xff]   ;;  %v729_v10 = vld [vmem:[#allocation7 + $0x8] sm:$0xff]   ;;  %v730_v11 = vld [vmem:[#allocation7] sm:$0xff]   ;;  %s481_s14 = sshll.u32 %s271_s13, 4  ;;  %s468_s16 = scalar_lea.sflag [#allocation4], %s1057_s30  ;;  %s1077_s14 = int_to_ptr.vmem [resolvable:$true] %s481_s14 }
  0x57   : > { %621 = vmatprep.subr.bf16.mxu0 %v886_v0  ;;  %629 = vmatprep.subr.bf16.mxu1 %v886_v0  ;;  %v586_v12 = vld [vmem:[%s1127_s2] ss:$0 sm:$0xff]  ;;  %s811_s8 = scalar_lea.vmem %s1077_s14, 256  ;;  %p1147_p2 = scmp.ne.s32.totalorder %s1140_s23, 0 }
  0x58   : > { %v591_v22 = vld [vmem:[%s1129_s4] ss:$0 sm:$0xff]  ;;  %p812_p5 = scmp.ne.s32.totalorder %s1077_s14, %s811_s8  ;;  %s888_s22 = smov [#allocation8]  }
  0x59   : > { %s815_s29 = sshll.u32 %s888_s22, 4  ;;  %s816_s29 = int_to_ptr.vmem [resolvable:$false] %s815_s29 }
  0x5a   : > { %622 = vmatpush3.bf16.msra.mxu0 %v721_v2  ;;  %630 = vmatpush3.bf16.msra.mxu1 %v724_v5  ;;  %p813_p7 = pnand %p812_p5, %p1147_p2  ;;  %s817_s6 = scalar_lea.vmem %s816_s29, 512 }
  0x5b   : > { %631 = vmatprep.subr.bf16.mxu1 %v886_v0  ;;  %p818_p13 = scmp.lt.s32.totalorder %s1077_s14, %s816_s29  ;;  %p819_p0 = scmp.lt.s32.totalorder %s817_s6, %s811_s8 }
  0x5c   : > { %p814_p12 = pneg %p813_p7 }
  0x5d   : > { %624 = vmatmul.mubr.msk.bf16.vlgmr.msra.gmra.mxu0 %vm305_vm1, %v722_v4  ;;  %p820_p10 = por %p819_p0, %p818_p13 }
  0x5e   : > { %632 = vmatpush3.bf16.msra.mxu1 %v725_v6 }
  0x5f   : > { %633 = vmatprep.subr.bf16.mxu1 %v886_v0  ;;  %p821_p3 = pnand %p820_p10, %p814_p12 }
  0x62   : > { %634 = vmatpush3.bf16.msra.mxu1 %v726_v7 }
  0x63   : > { %635 = vmatprep.subr.bf16.mxu1 %v886_v0 }
  0x66   : > { %636 = vmatpush3.bf16.msra.mxu1 %v727_v8 }
  0x67   : > { %637 = vmatprep.subr.bf16.mxu1 %v886_v0 }
  0x6a   : > { %638 = vmatpush3.bf16.msra.mxu1 %v728_v9 }
  0x6b   : > { %639 = vmatprep.subr.bf16.mxu1 %v886_v0 }
  0x6e   : > { %640 = vmatpush3.bf16.msra.mxu1 %v729_v10 }
  0x6f   : > { %641 = vmatprep.subr.bf16.mxu1 %v886_v0 }
  0x72   : > { %642 = vmatpush3.bf16.msra.mxu1 %v730_v11 }
 0x11d   : > { %v343_v13 = vpop.f32.mrf.mxu0 }
 0x11e   : > { %v344_v15 = vadd.f32 %v586_v12, %v343_v13 }
 0x11f   : > { %v625_v14 = vpop.f32.mrf.mxu0 }
 0x120   : > { %v350_v19 = vmax.f32 %v344_v15, 0.0 }
 0x121   : > { %v346_v16 = vpop.f32.mrf.mxu0 }
 0x122   : > { %v347_v17 = vadd.f32 %v586_v12, %v346_v16 }
 0x123   : > { %v626_v18 = vpop.f32.mrf.mxu0 }
 0x124   : > { %v351_v20 = vmax.f32 %v347_v17, 0.0 }
 0x126   : > { %v352_v21 = vpack.c.bf16 %v351_v20, %v350_v19 }
 0x128   : > { %644 = vmatmul.mubr.bf16.vlgmr.msra.gmra.mxu1 %v352_v21 }
 0x1e8   : > { %v458_v23 = vpop.f32.mrf.mxu1 }
 0x1e9   : > { %v459_v24 = vadd.f32 %v591_v22, %v458_v23 }
 0x1ea   : > { %v645_v25 = vpop.f32.mrf.mxu1 }
 0x1eb   : > { %465 = vst [vmem:[%s271_s13] sm:$0xff] %v459_v24 }
 0x1ec   : > { %v461_v26 = vpop.f32.mrf.mxu1 }
 0x1ed   : > { %v462_v27 = vadd.f32 %v591_v22, %v461_v26 }
 0x1ee   : > { %v646_v28 = vpop.f32.mrf.mxu1 }
 0x1ef   : > { %466 = vst [vmem:[%s271_s13 + $0x8] sm:$0xff] %v462_v27 }
 0x1f0   : > { %824 = shalt.err (!%p821_p3)
}
 0x1f1   : > { %s825_s24 = scalar_lea.hbm %s1082_s17, 256  ;;  %s829_s10 = scalar_lea.hbm %s1130_s5, 512 }
 0x1f2   : > { %p826_p11 = scmp.ne.s32.totalorder %s1082_s17, %s825_s24  ;;  %p830_p4 = scmp.lt.s32.totalorder %s1082_s17, %s1130_s5 }
 0x1f3   : > { %p831_p6 = scmp.lt.s32.totalorder %s829_s10, %s825_s24 }
 0x1f4   : > { %p827_p9 = pnand %p826_p11, %p1147_p2 }
 0x1f5   : > { %p832_p8 = por %p831_p6, %p830_p4 }
 0x1f6   : > { %p828_p1 = pneg %p827_p9 }
 0x1f8   : > { %p833_p5 = pnand %p832_p8, %p828_p1 }
 0x1fa   : > { %836 = shalt.err (!%p833_p5)
}
 0x1fb   : > { %s889_s7 = smov 128   ;;  %s890_s28 = smov 8  }
 0x1fc   : > { %657 = dma.vmem_to_hbm [thread:$0]  (%p1147_p2), %s1077_s14, 256, %s1082_s17, %s468_s16, %s889_s7, %s889_s7, %s890_s28  }
 0x1fd PF: > { %s496_s11 = sand.u32 1, %s867_s18   ;;  %p1148_p7 = scmp.ne.s32.totalorder %s1137_s25, 0 }
 0x1fe   : > { %p1149_p12 = scmp.ge.s32.totalorder %s879_s21, 2  ;;  %s497_s8 = scalar_lea.sflag [#allocation4], %s496_s11 }
 0x200   : > { %p671_p13 = pnand %p1149_p12, %p1148_p7 }
 0x202   : > { %p672_p0 = pneg %p671_p13 }
 0x204   : > { %862 = dma.done.wait (%p672_p0), %s497_s8, 256  }
 0x205   : > { %864 = vsyncadd (%p672_p0), %s497_s8, 4294967040  ;;  %p19_p10 = scmp.ge.s32.totalorder %s999_s15, 4   ;;  %s1150_s18 = smov %s871_s19 }
 0x206   : > { %s1151_s19 = smov %s875_s20  ;;  %s1152_s20 = smov %s1015_s27 }
 0x207   : > { %s1153_s21 = smov %s999_s15  ;;  %21 = sbr.rel (!%p19_p10) target bundleno = 6 (0x6), region = 93 }
 0x20c   :  { %502 = vsyncpa [#allocation3], 1 }
 0x20d   :  { %504 = vsyncpa [#allocation3 + $0x1], 1 }
 0x20e   :  { %505 = vsyncpa [#allocation6], 1 }
 0x20f   :  { %506 = vsyncpa [#allocation4], 1 }
 0x210   :  { %508 = vsyncpa [#allocation4 + $0x1], 1 }

</bundles_post_ra>
